<compile_context>
chip_gen: v7x
topology: tpu7x:2x2x1
jax: 0.10.0
libtpu: 0.0.40
codegen_flags: <defaults>
</compile_context>

<pallas_src>
import math
import jax
import jax.numpy as jnp
from jax import lax
from jax.experimental import pallas as pl
from jax.experimental.pallas import tpu as pltpu


def _ffn_kernel(x_ref, w_ref, b_ref, o_ref):
    # x_ref: (TM, D)   w_ref: (D, I)   b_ref: (1, I) [f32]   o_ref: (TM, I)
    h = jnp.dot(x_ref[...], w_ref[...], preferred_element_type=jnp.float32)
    h = h + b_ref[...]  # bias already f32 (cast hoisted to the wrapper)
    # exact GELU (matches nn.GELU() default, approximate='none')
    g = h * 0.5 * (1.0 + lax.erf(h * (1.0 / math.sqrt(2.0))))
    o_ref[...] = g.astype(o_ref.dtype)


def beit_feed_forward(hidden_states, weight, bias, *, tm=256):
    """hidden_states: (B, S, D); weight: (D, I); bias: (I,). Returns (B, S, I)."""
    B, S, D = hidden_states.shape
    I = weight.shape[1]
    M = B * S

    x2d = hidden_states.reshape(M, D)
    b2d = bias.astype(jnp.float32).reshape(1, I)

    # Row tile: either the full M (small inputs) or a multiple of 8 (sublane
    # alignment). 256 keeps the double-buffered working set well inside v7x's
    # 64 MiB VMEM for BEiT-base f32 and is MXU-aligned for v6e/v7x (256-wide).
    tm = min(tm, M)
    if tm != M:
        tm = max(8, (tm // 8) * 8)
    grid_m = pl.cdiv(M, tm)

    itemsize = jnp.dtype(hidden_states.dtype).itemsize
    cost = pl.CostEstimate(
        flops=2 * M * D * I,
        transcendentals=M * I,  # erf in the GELU epilogue
        bytes_accessed=(M * D + M * I) * itemsize
        + D * I * jnp.dtype(weight.dtype).itemsize
        + I * 4,
    )

    out2d = pl.pallas_call(
        _ffn_kernel,
        out_shape=jax.ShapeDtypeStruct((M, I), hidden_states.dtype),
        grid_spec=pltpu.PrefetchScalarGridSpec(
            num_scalar_prefetch=0,
            grid=(grid_m,),
            in_specs=[
                pl.BlockSpec((tm, D), lambda i: (i, 0)),   # streamed row tiles
                pl.BlockSpec((D, I), lambda i: (0, 0)),    # weight VMEM-resident
                pl.BlockSpec((1, I), lambda i: (0, 0)),    # bias VMEM-resident
            ],
            out_specs=pl.BlockSpec((tm, I), lambda i: (i, 0)),
        ),
        compiler_params=pltpu.CompilerParams(
            dimension_semantics=("parallel",)),  # shard rows across TCs on v7x
        cost_estimate=cost,
    )(x2d, weight, b2d)

    return out2d.reshape(B, S, I)


if __name__ == "__main__":
    # Small config consistent with the module:
    #   embedding_dimension = 32, intermediate_size = 128
    batch, seq, embed_dim, inter_dim = 2, 8, 32, 128

    key = jax.random.PRNGKey(0)
    kx, kw, kb = jax.random.split(key, 3)

    hidden_states = jax.random.normal(kx, (batch, seq, embed_dim), dtype=jnp.float32)
    # Synthetic deterministic parameters (PyTorch stores weight as
    # (intermediate, embed); we keep the transposed (embed, intermediate) layout).
    weight = jax.random.normal(kw, (embed_dim, inter_dim), dtype=jnp.float32) * (
        1.0 / math.sqrt(embed_dim))
    bias = jax.random.normal(kb, (inter_dim,), dtype=jnp.float32) * 0.01

    out = beit_feed_forward(hidden_states, weight, bias)
    jax.block_until_ready(out)

    # Reference check in plain JAX (exact GELU).
    ref = hidden_states.reshape(-1, embed_dim) @ weight + bias
    ref = ref * 0.5 * (1.0 + lax.erf(ref / math.sqrt(2.0)))
    ref = ref.reshape(batch, seq, inter_dim)
    assert jnp.allclose(out, ref, atol=1e-5, rtol=1e-5), "mismatch vs reference"

    print("KERNEL_OK")
</pallas_src>

<mosaic_0001>
module attributes {stable_mosaic.version = 11 : i64} {
  func.func @_ffn_kernel(%arg0: i32, %arg1: memref<16x32xf32, #tpu.memory_space<vmem>>, %arg2: memref<32x128xf32, #tpu.memory_space<vmem>>, %arg3: memref<1x128xf32, #tpu.memory_space<vmem>>, %arg4: memref<16x128xf32, #tpu.memory_space<vmem>>) attributes {dimension_semantics = [#tpu.dimension_semantics<parallel>], iteration_bounds = array<i64: 1>, scalar_prefetch = 0 : i64, scratch_operands = 0 : i64, tpu.core_type = #tpu.core_type<tc>, window_params = [{transform_indices = @transform_0, window_bounds = array<i64: 16, 32>}, {pipeline_mode = #tpu.pipeline_mode<synchronous>, transform_indices = @transform_1, window_bounds = array<i64: 32, 128>}, {pipeline_mode = #tpu.pipeline_mode<synchronous>, transform_indices = @transform_2, window_bounds = array<i64: 1, 128>}, {transform_indices = @transform_3, window_bounds = array<i64: 16, 128>}]} {
    %c0 = arith.constant 0 : index
    %c0_0 = arith.constant 0 : index
    %0 = vector.load %arg1[%c0, %c0_0] : memref<16x32xf32, #tpu.memory_space<vmem>>, vector<16x32xf32>
    %c0_1 = arith.constant 0 : index
    %c0_2 = arith.constant 0 : index
    %1 = vector.load %arg2[%c0_1, %c0_2] : memref<32x128xf32, #tpu.memory_space<vmem>>, vector<32x128xf32>
    %cst = arith.constant dense<0.000000e+00> : vector<16x128xf32>
    %2 = tpu.matmul %0, %1, %cst {dimension_numbers = #tpu.dot_dimension_numbers<[1], [0], [0], [1], [0, 0, 1, 1], [], []>} : vector<16x32xf32>, vector<32x128xf32>, vector<16x128xf32> -> vector<16x128xf32>
    %c0_3 = arith.constant 0 : index
    %c0_4 = arith.constant 0 : index
    %3 = vector.load %arg3[%c0_3, %c0_4] : memref<1x128xf32, #tpu.memory_space<vmem>>, vector<1x128xf32>
    %4 = vector.broadcast %3 : vector<1x128xf32> to vector<16x128xf32>
    %5 = arith.addf %2, %4 : vector<16x128xf32>
    %cst_5 = arith.constant 5.000000e-01 : f32
    %6 = vector.broadcast %cst_5 : f32 to vector<16x128xf32>
    %7 = arith.mulf %5, %6 : vector<16x128xf32>
    %cst_6 = arith.constant 0.707106769 : f32
    %8 = vector.broadcast %cst_6 : f32 to vector<16x128xf32>
    %9 = arith.mulf %5, %8 : vector<16x128xf32>
    %10 = math.erf %9 : vector<16x128xf32>
    %cst_7 = arith.constant 1.000000e+00 : f32
    %11 = vector.broadcast %cst_7 : f32 to vector<16x128xf32>
    %12 = arith.addf %11, %10 : vector<16x128xf32>
    %13 = arith.mulf %7, %12 : vector<16x128xf32>
    %c0_8 = arith.constant 0 : index
    %c0_9 = arith.constant 0 : index
    %14 = vector.load %arg4[%c0_8, %c0_9] : memref<16x128xf32, #tpu.memory_space<vmem>>, vector<16x128xf32>
    tpu.vector_store %arg4[%c0_8, %c0_9], %13 {strides = array<i32>} : memref<16x128xf32, #tpu.memory_space<vmem>>, vector<16x128xf32>,
    return
  }
  func.func @transform_0(%arg0: i32) -> (i32, i32) {
    %c0_i32 = arith.constant 0 : i32
    %c0_i32_0 = arith.constant 0 : i32
    return %arg0, %c0_i32 : i32, i32
  }
  func.func @transform_1(%arg0: i32) -> (i32, i32) {
    %c0_i32 = arith.constant 0 : i32
    %c0_i32_0 = arith.constant 0 : i32
    %c0_i32_1 = arith.constant 0 : i32
    return %c0_i32, %c0_i32_0 : i32, i32
  }
  func.func @transform_2(%arg0: i32) -> (i32, i32) {
    %c0_i32 = arith.constant 0 : i32
    %c0_i32_0 = arith.constant 0 : i32
    %c0_i32_1 = arith.constant 0 : i32
    return %c0_i32, %c0_i32_0 : i32, i32
  }
  func.func @transform_3(%arg0: i32) -> (i32, i32) {
    %c0_i32 = arith.constant 0 : i32
    %c0_i32_0 = arith.constant 0 : i32
    return %arg0, %c0_i32 : i32, i32
  }
}

</mosaic_0001>

<bundles_post_ra>
// kernel: tpu_custom_call.1
= control target key start
LH: loop header
LB: loop body
LE: loop exit
PB: predicated region body
PF: predicated region fallthrough
CT: control target
= control target key end

     0   :  { %8 = vsyncpa [#allocation3], 0  ;;  %s350_s0 = inlined_call_operand.hbm [shape: f32[16,32], index: 0, kind: input, shape index: {}]   ;;  %s351_s1 = inlined_call_operand.hbm [shape: f32[32,128], index: 1, kind: input, shape index: {}]   ;;  %s352_s2 = inlined_call_operand.vmem [shape: f32[1,128], index: 2, kind: input, shape index: {}]   ;;  %s353_s3 = inlined_call_operand.hbm [shape: f32[16,128], index: 3, kind: output, shape index: {}]  }
   0x1   :  { %9 = vsyncpa [#allocation6], 0 }
   0x2   :  { %10 = vsyncpa [#allocation4], 0  ;;  %s277_s12 = smov [#allocation2]   ;;  %s205_s16 = scalar_lea.hbm %s350_s0, 256 }
   0x3   :  { %s16_s13 = sshll.u32 %s277_s12, 4  ;;  %p206_p0 = scmp.ne.s32.totalorder %s350_s0, %s205_s16  ;;  %s17_s13 = int_to_ptr.vmem [resolvable:$true] %s16_s13 }
   0x4   :  { %p209_p1 = scmp.lt.u32.totalorder %s205_s16, %s350_s0 }
   0x6   :  { %p211_p2 = pnand %p209_p1, %p206_p0 }
   0x8   :  { %214 = shalt.err (!%p211_p2)
}
   0x9   :  { %s215_s21 = scalar_lea.vmem %s17_s13, 256  ;;  %p220_p4 = scmp.lt.s32.totalorder %s17_s13, %s17_s13 }
   0xa   :  { %p216_p3 = scmp.ne.s32.totalorder %s17_s13, %s215_s21  ;;  %p221_p5 = scmp.lt.s32.totalorder %s215_s21, %s215_s21 }
   0xc   :  { %p222_p6 = por %p221_p5, %p220_p4 }
   0xe   :  { %p223_p7 = pnand %p222_p6, %p216_p3 }
  0x10   :  { %226 = shalt.err (!%p223_p7)
}
  0x11   :  { %s278_s22 = smov 128   ;;  %s279_s23 = smov 8  }
  0x12   :  { %22 = dma.hbm_to_vmem [thread:$0]  %s350_s0, 256, %s17_s13, [#allocation3], %s278_s22, %s278_s22, %s279_s23  }
  0x13   :  { %s280_s26 = smov [#allocation5]   ;;  %s227_s30 = scalar_lea.hbm %s351_s1, 512 }
  0x14   :  { %s28_s27 = sshll.u32 %s280_s26, 4  ;;  %p228_p8 = scmp.ne.s32.totalorder %s351_s1, %s227_s30  ;;  %s29_s27 = int_to_ptr.vmem [resolvable:$true] %s28_s27 }
  0x15   :  { %p231_p9 = scmp.lt.u32.totalorder %s227_s30, %s351_s1 }
  0x17   :  { %p233_p10 = pnand %p231_p9, %p228_p8 }
  0x19   :  { %236 = shalt.err (!%p233_p10)
}
  0x1a   :  { %s237_s8 = scalar_lea.vmem %s29_s27, 512  ;;  %p242_p12 = scmp.lt.s32.totalorder %s29_s27, %s29_s27 }
  0x1b   :  { %p238_p11 = scmp.ne.s32.totalorder %s29_s27, %s237_s8  ;;  %p243_p13 = scmp.lt.s32.totalorder %s237_s8, %s237_s8 }
  0x1d   :  { %p244_p0 = por %p243_p13, %p242_p12 }
  0x1f   :  { %p245_p1 = pnand %p244_p0, %p238_p11 }
  0x21   :  { %248 = shalt.err (!%p245_p1)
}
  0x22   :  { %34 = dma.hbm_to_vmem [thread:$0]  %s351_s1, 512, %s29_s27, [#allocation6], %s278_s22, %s278_s22, %s279_s23  }
  0x23   :  { %271 = dma.done.wait [#allocation3], 256  }
  0x24   :  { %272 = vsyncadd [#allocation3], 4294967040 }
  0x25   :  { %273 = dma.done.wait [#allocation6], 512  }
  0x26   :  { %274 = vsyncadd [#allocation6], 4294966784  ;;  %vm56_vm0 = vcmask 261120   ;;  %v45_v0 = vld [vmem:[#allocation5] sm:$0xff]  ;;  %v46_v1 = vld [vmem:[#allocation5 + $0x8] sm:$0xff]  ;;  %s281_s11 = smov [#allocation7]  }
  0x27   :  { %v47_v2 = vld [vmem:[#allocation5 + $0x10] sm:$0xff]  ;;  %v188_v3 = vpack.c.bf16 %v46_v1, %v45_v0  ;;  %v48_v4 = vld [vmem:[#allocation5 + $0x18] sm:$0xff]  ;;  %s155_s12 = sshll.u32 %s281_s11, 4  ;;  %s156_s12 = int_to_ptr.vmem [resolvable:$true] %s155_s12 }
  0x28   :  { %v43_v5 = vld [vmem:[#allocation2] sm:$0xff]  ;;  %v192_v6 = vpack.c.bf16 %v48_v4, %v47_v2  ;;  %v44_v7 = vld [vmem:[#allocation2 + $0x8] sm:$0xff]  ;;  %p254_p3 = scmp.lt.s32.totalorder %s156_s12, %s156_s12 }
  0x29   :  { %185 = vmatprep.mubr.msk.f32.mxu0 %vm56_vm0, %v43_v5  ;;  %189 = vmatprep.subr.bf16.mxu0 %v188_v3  ;;  %v168_v8 = vld [vmem:[%s352_s2] ss:$0 sm:$0xff]  ;;  %s249_s2 = scalar_lea.vmem %s156_s12, 256 }
  0x2a   :  { %191 = vmatpush3.bf16.msra.mxu0 %v188_v3  ;;  %p250_p2 = scmp.ne.s32.totalorder %s156_s12, %s249_s2  ;;  %p255_p4 = scmp.lt.s32.totalorder %s249_s2, %s249_s2 }
  0x2b   :  { %193 = vmatprep.subr.bf16.mxu0 %v192_v6 }
  0x2c   :  { %p256_p5 = por %p255_p4, %p254_p3 }
  0x2e   :  { %195 = vmatpush3.bf16.msra.mxu0 %v192_v6  ;;  %p257_p6 = pnand %p256_p5, %p250_p2 }
  0x31   :  { %186 = vmatmul.mubr.msk.f32.vlgmr.msra.gmra.mrb[0].mxu0 %vm56_vm0, %v44_v7 }
 0x104   :  { %v187_v9 = vpop.f32.mrb[0].mxu0 }
 0x105   :  { %v135_v10 = vadd.f32 %v187_v9, %v168_v8  ;;  %v129_v11 = vpop.f32.mrb[1].mxu0 }
 0x106   :  { %v130_v12 = vadd.f32 %v168_v8, %v129_v11 }
 0x107   :  { %v141_v13 = vmul.f32 0.70710677, %v135_v10  ;;  %v139_v17 = vmul.f32 0.5, %v135_v10 }
 0x108   :  { %v140_v14 = vmul.f32 0.70710677, %v130_v12  ;;  %v138_v19 = vmul.f32 0.5, %v130_v12 }
 0x109   :  { %201 = verf.f32 %v141_v13 }
 0x10a   :  { %203 = verf.f32 %v140_v14 }
 0x113   :  { %v202_v15 = vpop.eup %201 }
 0x114   :  { %v204_v16 = vpop.eup %203  ;;  %v145_v18 = vadd.f32 1.0, %v202_v15 }
 0x115   :  { %v144_v20 = vadd.f32 1.0, %v204_v16 }
 0x116   :  { %v147_v21 = vmul.f32 %v145_v18, %v139_v17 }
 0x117   :  { %v146_v22 = vmul.f32 %v144_v20, %v138_v19 }
 0x118   :  { %149 = vst [vmem:[#allocation7 + $0x8] sm:$0xff] %v147_v21 }
 0x119   :  { %148 = vst [vmem:[#allocation7] sm:$0xff] %v146_v22 }
 0x11a   :  { %260 = shalt.err (!%p257_p6)
}
 0x11b   :  { %s261_s15 = scalar_lea.hbm %s353_s3, 256 }
 0x11c   :  { %p262_p7 = scmp.ne.s32.totalorder %s353_s3, %s261_s15  ;;  %p265_p8 = scmp.lt.u32.totalorder %s261_s15, %s353_s3 }
 0x11e   :  { %p267_p9 = pnand %p265_p8, %p262_p7 }
 0x120   :  { %270 = shalt.err (!%p267_p9)
}
 0x121   :  { %161 = dma.vmem_to_hbm [thread:$0]  %s156_s12, 256, %s353_s3, [#allocation4], %s278_s22, %s278_s22, %s279_s23  }
 0x122   :  { %275 = dma.done.wait [#allocation4], 256  }
 0x123   :  { %276 = vsyncadd [#allocation4], 4294967040 }
 0x124   :  { %165 = vsyncpa [#allocation3], 1 }
 0x125   :  { %166 = vsyncpa [#allocation6], 1 }
 0x126   :  { %167 = vsyncpa [#allocation4], 1 }

</bundles_post_ra>
